<compile_context>
chip_gen: v7x
topology: tpu7x:2x2x1
jax: 0.10.0
libtpu: 0.0.40
codegen_flags: <defaults>
</compile_context>

<pallas_src>
import functools

import jax
import jax.numpy as jnp
from jax.experimental import pallas as pl
from jax.experimental.pallas import tpu as pltpu


# -----------------------------------------------------------------------------
# Pallas kernel: fused graph propagation + running layer-sum accumulation.
# Grid = (M // tm, K // tk); k (reduction) is innermost / "arbitrary", output
# blocks are resident accumulators across it.
# -----------------------------------------------------------------------------
def _prop_accum_kernel(a_ref, x_ref, s_ref, e_ref, so_ref, acc_ref):
    k = pl.program_id(1)
    contrib = jnp.dot(a_ref[...], x_ref[...], preferred_element_type=jnp.float32)

    @pl.when(k == 0)
    def _():
        acc_ref[...] = contrib          # init by dot: no zero-store + reload + add

    @pl.when(k > 0)
    def _():
        acc_ref[...] += contrib

    @pl.when(k == pl.num_programs(1) - 1)
    def _():
        e_ref[...] = acc_ref[...].astype(e_ref.dtype)      # bf16 next-layer input
        so_ref[...] = s_ref[...] + acc_ref[...]             # f32 running sum


def _pick_tile(dim, cap, min_programs=1):
    """Largest multiple of 128 <= cap dividing dim, leaving >= min_programs blocks."""
    assert dim % 128 == 0
    best = None
    t = 128
    while t <= min(cap, dim):
        if dim % t == 0 and dim // t >= min_programs:
            best = t
        t += 128
    if best is None:                     # problem too small to split: relax
        t = 128
        while t <= min(cap, dim):
            if dim % t == 0:
                best = t
            t += 128
    return best


def propagate_accumulate(a_hat, x, run_sum, *, tm=None, tk=None):
    """One LightGCN propagation step fused with layer-sum accumulation.

    a_hat:   [M, K] bf16 dense normalized adjacency
    x:       [K, D] bf16 current layer embeddings
    run_sum: [M, D] f32  running sum of layer embeddings (updated in place)
    returns: (e_new [M, D] bf16, run_sum_new [M, D] f32)
    """
    M, K = a_hat.shape
    K2, D = x.shape
    assert K == K2 and run_sum.shape == (M, D)
    assert M % 128 == 0 and K % 128 == 0 and D % 128 == 0

    # Tile selection: tn == D (lane-dense output); tm small enough that the
    # parallel axis has >= 2 programs (v7x megacore); tk large for DMA burst
    # efficiency on the HBM-bound A_hat stream but capped for v7x VMEM.
    if tm is None:
        tm = _pick_tile(M, cap=512, min_programs=2)
    if tk is None:
        tk = _pick_tile(K, cap=2048, min_programs=1)

    # VMEM watermark estimate: double-buffered A/X/S/E/S_out tiles + f32 acc.
    est_vmem = (2 * (tm * tk * 2 + tk * D * 2 + tm * D * 4 + tm * D * 2 + tm * D * 4)
                + tm * D * 4)
    vmem_limit = int(min(48 * 2**20, max(32 * 2**20, 2 * est_vmem)))

    cost = pl.CostEstimate(
        flops=2 * M * K * D,
        transcendentals=0,
        bytes_accessed=M * K * 2 + (M // tm) * K * D * 2 + M * D * (4 + 2 + 4),
    )

    return pl.pallas_call(
        _prop_accum_kernel,
        out_shape=(
            jax.ShapeDtypeStruct((M, D), x.dtype),       # E_{k+1} (bf16)
            jax.ShapeDtypeStruct((M, D), jnp.float32),   # updated running sum
        ),
        grid_spec=pltpu.PrefetchScalarGridSpec(
            num_scalar_prefetch=0,
            grid=(M // tm, K // tk),
            in_specs=[
                pl.BlockSpec((tm, tk), lambda i, k: (i, k)),   # A_hat tile
                pl.BlockSpec((tk, D), lambda i, k: (k, 0)),    # X tile
                pl.BlockSpec((tm, D), lambda i, k: (i, 0)),    # S (resident over k)
            ],
            out_specs=[
                pl.BlockSpec((tm, D), lambda i, k: (i, 0)),
                pl.BlockSpec((tm, D), lambda i, k: (i, 0)),
            ],
            scratch_shapes=[pltpu.VMEM((tm, D), jnp.float32)],
        ),
        compiler_params=pltpu.CompilerParams(
            dimension_semantics=("parallel", "arbitrary"),
            vmem_limit_bytes=vmem_limit,
        ),
        cost_estimate=cost,
        input_output_aliases={2: 1},     # run_sum accumulated in place (P8)
    )(a_hat, x, run_sum)


# -----------------------------------------------------------------------------
# LGCN_Encoder in JAX, using the fused Pallas kernel
# -----------------------------------------------------------------------------
@functools.partial(jax.jit, static_argnames=("n_layers",))
def lgcn_all_embeddings(norm_adj_bf16, user_emb, item_emb, *, n_layers):
    ego_f32 = jnp.concatenate([user_emb, item_emb], axis=0)
    run_sum = ego_f32                           # layer-0 term of the mean (f32)
    ego = ego_f32.astype(jnp.bfloat16)          # bf16 matmul input
    for _ in range(n_layers):
        ego, run_sum = propagate_accumulate(norm_adj_bf16, ego, run_sum)
    return run_sum * (1.0 / (n_layers + 1))     # mean over L+1 layer embeddings


def xavier_uniform(key, shape, dtype=jnp.float32):
    fan_in, fan_out = shape
    bound = jnp.sqrt(6.0 / (fan_in + fan_out))
    return jax.random.uniform(key, shape, dtype, minval=-bound, maxval=bound)


def build_norm_adj(key, user_count, item_count, density=0.05):
    """Deterministic symmetric-normalized bipartite adjacency (dense f32)."""
    n = user_count + item_count
    r = (jax.random.uniform(key, (user_count, item_count)) < density).astype(
        jnp.float32
    )
    a = jnp.zeros((n, n), jnp.float32)
    a = a.at[:user_count, user_count:].set(r)
    a = a.at[user_count:, :user_count].set(r.T)
    deg = jnp.sum(a, axis=1)
    d_inv_sqrt = jnp.where(deg > 0, 1.0 / jnp.sqrt(jnp.maximum(deg, 1e-12)), 0.0)
    return a * d_inv_sqrt[:, None] * d_inv_sqrt[None, :]


class LGCNEncoder:
    def __init__(self, key, user_count, item_count, latent_size, norm_adj,
                 n_layers=3):
        self.user_count = user_count
        self.item_count = item_count
        self.latent_size = latent_size
        self.n_layers = n_layers
        self.norm_adj = norm_adj                              # dense [N, N] f32
        self.norm_adj_bf16 = norm_adj.astype(jnp.bfloat16)    # matmul input dtype
        ku, ki = jax.random.split(key)
        self.user_emb = xavier_uniform(ku, (user_count, latent_size))
        self.item_emb = xavier_uniform(ki, (item_count, latent_size))

    def _all_embeddings(self):
        return lgcn_all_embeddings(
            self.norm_adj_bf16, self.user_emb, self.item_emb,
            n_layers=self.n_layers,
        )

    def forward(self, inputs):
        # drop_flag=False path (module default): no sparse dropout.
        all_e = self._all_embeddings()
        user_all = all_e[: self.user_count, :]
        item_all = all_e[self.user_count:, :]
        users, items = inputs["user"], inputs["item"]
        return jnp.take(user_all, users, axis=0), jnp.take(item_all, items, axis=0)

    def get_embedding(self):
        all_e = self._all_embeddings()
        return all_e[: self.user_count, :], all_e[self.user_count:, :]


# -----------------------------------------------------------------------------
# Pure-JAX reference mirroring the kernel numerics (bf16 inputs, f32 accum)
# -----------------------------------------------------------------------------
def reference_all_embeddings(norm_adj, user_emb, item_emb, n_layers):
    ego = jnp.concatenate([user_emb, item_emb], axis=0)
    a16 = norm_adj.astype(jnp.bfloat16)
    run_sum = ego
    e16 = ego.astype(jnp.bfloat16)
    for _ in range(n_layers):
        res = jnp.dot(a16, e16, preferred_element_type=jnp.float32)
        run_sum = run_sum + res
        e16 = res.astype(jnp.bfloat16)
    return run_sum / (n_layers + 1)


if __name__ == "__main__":
    key = jax.random.PRNGKey(0)
    k_adj, k_emb, k_u, k_i = jax.random.split(key, 4)

    user_count = 96
    item_count = 160            # N = 256 nodes
    latent_size = 128
    n_layers = 3

    norm_adj = build_norm_adj(k_adj, user_count, item_count, density=0.08)
    enc = LGCNEncoder(k_emb, user_count, item_count, latent_size, norm_adj,
                      n_layers=n_layers)

    batch = 8
    inputs = {
        "user": jax.random.randint(k_u, (batch,), 0, user_count),
        "item": jax.random.randint(k_i, (batch,), 0, item_count),
    }

    u_emb, i_emb = enc.forward(inputs)
    u_emb = jax.block_until_ready(u_emb)
    i_emb = jax.block_until_ready(i_emb)

    all_ref = reference_all_embeddings(norm_adj, enc.user_emb, enc.item_emb,
                                       n_layers)
    u_ref = all_ref[:user_count][inputs["user"]]
    i_ref = all_ref[user_count:][inputs["item"]]

    assert u_emb.shape == (batch, latent_size) and i_emb.shape == (batch, latent_size)
    assert jnp.allclose(u_emb, u_ref, atol=2e-3, rtol=2e-2), "user embeddings mismatch"
    assert jnp.allclose(i_emb, i_ref, atol=2e-3, rtol=2e-2), "item embeddings mismatch"

    print("KERNEL_OK")
</pallas_src>

<mosaic_0001>
module attributes {stable_mosaic.version = 11 : i64} {
  func.func @_prop_accum_kernel(%arg0: i32, %arg1: i32, %arg2: memref<128x256xbf16, #tpu.memory_space<vmem>>, %arg3: memref<256x128xbf16, #tpu.memory_space<vmem>>, %arg4: memref<128x128xf32, #tpu.memory_space<vmem>>, %arg5: memref<128x128xbf16, #tpu.memory_space<vmem>>, %arg6: memref<128x128xf32, #tpu.memory_space<vmem>>, %arg7: memref<128x128xf32, #tpu.memory_space<vmem>>) attributes {dimension_semantics = [#tpu.dimension_semantics<parallel>, #tpu.dimension_semantics<arbitrary>], iteration_bounds = array<i64: 2, 1>, scalar_prefetch = 0 : i64, scratch_operands = 1 : i64, tpu.core_type = #tpu.core_type<tc>, window_params = [{transform_indices = @transform_0, window_bounds = array<i64: 128, 256>}, {transform_indices = @transform_1, window_bounds = array<i64: 256, 128>}, {transform_indices = @transform_2, window_bounds = array<i64: 128, 128>}, {transform_indices = @transform_3, window_bounds = array<i64: 128, 128>}, {transform_indices = @transform_4, window_bounds = array<i64: 128, 128>}]} {
    %c0 = arith.constant 0 : index
    %c0_0 = arith.constant 0 : index
    %0 = vector.load %arg2[%c0, %c0_0] : memref<128x256xbf16, #tpu.memory_space<vmem>>, vector<128x256xbf16>
    %c0_1 = arith.constant 0 : index
    %c0_2 = arith.constant 0 : index
    %1 = vector.load %arg3[%c0_1, %c0_2] : memref<256x128xbf16, #tpu.memory_space<vmem>>, vector<256x128xbf16>
    %cst = arith.constant dense<0.000000e+00> : vector<128x128xf32>
    %2 = tpu.matmul %0, %1, %cst {dimension_numbers = #tpu.dot_dimension_numbers<[1], [0], [0], [1], [0, 0, 1, 1], [], []>} : vector<128x256xbf16>, vector<256x128xbf16>, vector<128x128xf32> -> vector<128x128xf32>
    %c0_i32 = arith.constant 0 : i32
    %3 = arith.cmpi eq, %arg1, %c0_i32 : i32
    %4 = arith.extui %3 : i1 to i32
    %c0_i32_3 = arith.constant 0 : i32
    %5 = arith.cmpi ne, %4, %c0_i32_3 : i32
    scf.if %5 {
      %c0_8 = arith.constant 0 : index
      %c0_9 = arith.constant 0 : index
      %12 = vector.load %arg7[%c0_8, %c0_9] : memref<128x128xf32, #tpu.memory_space<vmem>>, vector<128x128xf32>
      tpu.vector_store %arg7[%c0_8, %c0_9], %2 {strides = array<i32>} : memref<128x128xf32, #tpu.memory_space<vmem>>, vector<128x128xf32>,
    } else {
    }
    %c0_i32_4 = arith.constant 0 : i32
    %6 = arith.cmpi sgt, %arg1, %c0_i32_4 : i32
    %7 = arith.extui %6 : i1 to i32
    %c0_i32_5 = arith.constant 0 : i32
    %8 = arith.cmpi ne, %7, %c0_i32_5 : i32
    scf.if %8 {
      %c0_8 = arith.constant 0 : index
      %c0_9 = arith.constant 0 : index
      %12 = vector.load %arg7[%c0_8, %c0_9] : memref<128x128xf32, #tpu.memory_space<vmem>>, vector<128x128xf32>
      %13 = arith.addf %12, %2 : vector<128x128xf32>
      %c0_10 = arith.constant 0 : index
      %c0_11 = arith.constant 0 : index
      %14 = vector.load %arg7[%c0_10, %c0_11] : memref<128x128xf32, #tpu.memory_space<vmem>>, vector<128x128xf32>
      tpu.vector_store %arg7[%c0_10, %c0_11], %13 {strides = array<i32>} : memref<128x128xf32, #tpu.memory_space<vmem>>, vector<128x128xf32>,
    } else {
    }
    %c0_i32_6 = arith.constant 0 : i32
    %9 = arith.cmpi eq, %arg1, %c0_i32_6 : i32
    %10 = arith.extui %9 : i1 to i32
    %c0_i32_7 = arith.constant 0 : i32
    %11 = arith.cmpi ne, %10, %c0_i32_7 : i32
    scf.if %11 {
      %c0_8 = arith.constant 0 : index
      %c0_9 = arith.constant 0 : index
      %12 = vector.load %arg7[%c0_8, %c0_9] : memref<128x128xf32, #tpu.memory_space<vmem>>, vector<128x128xf32>
      %13 = arith.truncf %12 : vector<128x128xf32> to vector<128x128xbf16>
      %c0_10 = arith.constant 0 : index
      %c0_11 = arith.constant 0 : index
      %14 = vector.load %arg5[%c0_10, %c0_11] : memref<128x128xbf16, #tpu.memory_space<vmem>>, vector<128x128xbf16>
      tpu.vector_store %arg5[%c0_10, %c0_11], %13 {strides = array<i32>} : memref<128x128xbf16, #tpu.memory_space<vmem>>, vector<128x128xbf16>,
      %c0_12 = arith.constant 0 : index
      %c0_13 = arith.constant 0 : index
      %15 = vector.load %arg4[%c0_12, %c0_13] : memref<128x128xf32, #tpu.memory_space<vmem>>, vector<128x128xf32>
      %c0_14 = arith.constant 0 : index
      %c0_15 = arith.constant 0 : index
      %16 = vector.load %arg7[%c0_14, %c0_15] : memref<128x128xf32, #tpu.memory_space<vmem>>, vector<128x128xf32>
      %17 = arith.addf %15, %16 : vector<128x128xf32>
      %c0_16 = arith.constant 0 : index
      %c0_17 = arith.constant 0 : index
      %18 = vector.load %arg6[%c0_16, %c0_17] : memref<128x128xf32, #tpu.memory_space<vmem>>, vector<128x128xf32>
      tpu.vector_store %arg6[%c0_16, %c0_17], %17 {strides = array<i32>} : memref<128x128xf32, #tpu.memory_space<vmem>>, vector<128x128xf32>,
    } else {
    }
    return
  }
  func.func @transform_0(%arg0: i32, %arg1: i32) -> (i32, i32) {
    %c0_i32 = arith.constant 0 : i32
    return %arg0, %arg1 : i32, i32
  }
  func.func @transform_1(%arg0: i32, %arg1: i32) -> (i32, i32) {
    %c0_i32 = arith.constant 0 : i32
    %c0_i32_0 = arith.constant 0 : i32
    return %arg1, %c0_i32 : i32, i32
  }
  func.func @transform_2(%arg0: i32, %arg1: i32) -> (i32, i32) {
    %c0_i32 = arith.constant 0 : i32
    %c0_i32_0 = arith.constant 0 : i32
    return %arg0, %c0_i32 : i32, i32
  }
  func.func @transform_3(%arg0: i32, %arg1: i32) -> (i32, i32) {
    %c0_i32 = arith.constant 0 : i32
    %c0_i32_0 = arith.constant 0 : i32
    return %arg0, %c0_i32 : i32, i32
  }
  func.func @transform_4(%arg0: i32, %arg1: i32) -> (i32, i32) {
    %c0_i32 = arith.constant 0 : i32
    %c0_i32_0 = arith.constant 0 : i32
    return %arg0, %c0_i32 : i32, i32
  }
}

module attributes {stable_mosaic.version = 11 : i64} {
  func.func @_prop_accum_kernel(%arg0: i32, %arg1: i32, %arg2: memref<128x256xbf16, #tpu.memory_space<vmem>>, %arg3: memref<256x128xbf16, #tpu.memory_space<vmem>>, %arg4: memref<128x128xf32, #tpu.memory_space<vmem>>, %arg5: memref<128x128xbf16, #tpu.memory_space<vmem>>, %arg6: memref<128x128xf32, #tpu.memory_space<vmem>>, %arg7: memref<128x128xf32, #tpu.memory_space<vmem>>) attributes {dimension_semantics = [#tpu.dimension_semantics<parallel>, #tpu.dimension_semantics<arbitrary>], iteration_bounds = array<i64: 2, 1>, scalar_prefetch = 0 : i64, scratch_operands = 1 : i64, tpu.core_type = #tpu.core_type<tc>, window_params = [{transform_indices = @transform_0, window_bounds = array<i64: 128, 256>}, {transform_indices = @transform_1, window_bounds = array<i64: 256, 128>}, {transform_indices = @transform_2, window_bounds = array<i64: 128, 128>}, {transform_indices = @transform_3, window_bounds = array<i64: 128, 128>}, {transform_indices = @transform_4, window_bounds = array<i64: 128, 128>}]} {
    %c0 = arith.constant 0 : index
    %c0_0 = arith.constant 0 : index
    %0 = vector.load %arg2[%c0, %c0_0] : memref<128x256xbf16, #tpu.memory_space<vmem>>, vector<128x256xbf16>
    %c0_1 = arith.constant 0 : index
    %c0_2 = arith.constant 0 : index
    %1 = vector.load %arg3[%c0_1, %c0_2] : memref<256x128xbf16, #tpu.memory_space<vmem>>, vector<256x128xbf16>
    %cst = arith.constant dense<0.000000e+00> : vector<128x128xf32>
    %2 = tpu.matmul %0, %1, %cst {dimension_numbers = #tpu.dot_dimension_numbers<[1], [0], [0], [1], [0, 0, 1, 1], [], []>} : vector<128x256xbf16>, vector<256x128xbf16>, vector<128x128xf32> -> vector<128x128xf32>
    %c0_i32 = arith.constant 0 : i32
    %3 = arith.cmpi eq, %arg1, %c0_i32 : i32
    %4 = arith.extui %3 : i1 to i32
    %c0_i32_3 = arith.constant 0 : i32
    %5 = arith.cmpi ne, %4, %c0_i32_3 : i32
    scf.if %5 {
      %c0_8 = arith.constant 0 : index
      %c0_9 = arith.constant 0 : index
      %12 = vector.load %arg7[%c0_8, %c0_9] : memref<128x128xf32, #tpu.memory_space<vmem>>, vector<128x128xf32>
      tpu.vector_store %arg7[%c0_8, %c0_9], %2 {strides = array<i32>} : memref<128x128xf32, #tpu.memory_space<vmem>>, vector<128x128xf32>,
    } else {
    }
    %c0_i32_4 = arith.constant 0 : i32
    %6 = arith.cmpi sgt, %arg1, %c0_i32_4 : i32
    %7 = arith.extui %6 : i1 to i32
    %c0_i32_5 = arith.constant 0 : i32
    %8 = arith.cmpi ne, %7, %c0_i32_5 : i32
    scf.if %8 {
      %c0_8 = arith.constant 0 : index
      %c0_9 = arith.constant 0 : index
      %12 = vector.load %arg7[%c0_8, %c0_9] : memref<128x128xf32, #tpu.memory_space<vmem>>, vector<128x128xf32>
      %13 = arith.addf %12, %2 : vector<128x128xf32>
      %c0_10 = arith.constant 0 : index
      %c0_11 = arith.constant 0 : index
      %14 = vector.load %arg7[%c0_10, %c0_11] : memref<128x128xf32, #tpu.memory_space<vmem>>, vector<128x128xf32>
      tpu.vector_store %arg7[%c0_10, %c0_11], %13 {strides = array<i32>} : memref<128x128xf32, #tpu.memory_space<vmem>>, vector<128x128xf32>,
    } else {
    }
    %c0_i32_6 = arith.constant 0 : i32
    %9 = arith.cmpi eq, %arg1, %c0_i32_6 : i32
    %10 = arith.extui %9 : i1 to i32
    %c0_i32_7 = arith.constant 0 : i32
    %11 = arith.cmpi ne, %10, %c0_i32_7 : i32
    scf.if %11 {
      %c0_8 = arith.constant 0 : index
      %c0_9 = arith.constant 0 : index
      %12 = vector.load %arg7[%c0_8, %c0_9] : memref<128x128xf32, #tpu.memory_space<vmem>>, vector<128x128xf32>
      %13 = arith.truncf %12 : vector<128x128xf32> to vector<128x128xbf16>
      %c0_10 = arith.constant 0 : index
      %c0_11 = arith.constant 0 : index
      %14 = vector.load %arg5[%c0_10, %c0_11] : memref<128x128xbf16, #tpu.memory_space<vmem>>, vector<128x128xbf16>
      tpu.vector_store %arg5[%c0_10, %c0_11], %13 {strides = array<i32>} : memref<128x128xbf16, #tpu.memory_space<vmem>>, vector<128x128xbf16>,
      %c0_12 = arith.constant 0 : index
      %c0_13 = arith.constant 0 : index
      %15 = vector.load %arg4[%c0_12, %c0_13] : memref<128x128xf32, #tpu.memory_space<vmem>>, vector<128x128xf32>
      %c0_14 = arith.constant 0 : index
      %c0_15 = arith.constant 0 : index
      %16 = vector.load %arg7[%c0_14, %c0_15] : memref<128x128xf32, #tpu.memory_space<vmem>>, vector<128x128xf32>
      %17 = arith.addf %15, %16 : vector<128x128xf32>
      %c0_16 = arith.constant 0 : index
      %c0_17 = arith.constant 0 : index
      %18 = vector.load %arg6[%c0_16, %c0_17] : memref<128x128xf32, #tpu.memory_space<vmem>>, vector<128x128xf32>
      tpu.vector_store %arg6[%c0_16, %c0_17], %17 {strides = array<i32>} : memref<128x128xf32, #tpu.memory_space<vmem>>, vector<128x128xf32>,
    } else {
    }
    return
  }
  func.func @transform_0(%arg0: i32, %arg1: i32) -> (i32, i32) {
    %c0_i32 = arith.constant 0 : i32
    return %arg0, %arg1 : i32, i32
  }
  func.func @transform_1(%arg0: i32, %arg1: i32) -> (i32, i32) {
    %c0_i32 = arith.constant 0 : i32
    %c0_i32_0 = arith.constant 0 : i32
    return %arg1, %c0_i32 : i32, i32
  }
  func.func @transform_2(%arg0: i32, %arg1: i32) -> (i32, i32) {
    %c0_i32 = arith.constant 0 : i32
    %c0_i32_0 = arith.constant 0 : i32
    return %arg0, %c0_i32 : i32, i32
  }
  func.func @transform_3(%arg0: i32, %arg1: i32) -> (i32, i32) {
    %c0_i32 = arith.constant 0 : i32
    %c0_i32_0 = arith.constant 0 : i32
    return %arg0, %c0_i32 : i32, i32
  }
  func.func @transform_4(%arg0: i32, %arg1: i32) -> (i32, i32) {
    %c0_i32 = arith.constant 0 : i32
    %c0_i32_0 = arith.constant 0 : i32
    return %arg0, %c0_i32 : i32, i32
  }
}

</mosaic_0001>

<bundles_post_ra>
// kernel: lgcn_all_embeddings.3
= control target key start
LH: loop header
LB: loop body
LE: loop exit
PB: predicated region body
PF: predicated region fallthrough
CT: control target
= control target key end

     0   :  { %s1301_s15 = smov 0   ;;  %s1303_s16 = smov 0   ;;  %s1467_s0 = inlined_call_operand.vmem [shape: bf16[256,256], index: 0, kind: input, shape index: {}]   ;;  %s1468_s1 = inlined_call_operand.vmem [shape: bf16[256,128], index: 1, kind: input, shape index: {}]   ;;  %s1469_s2 = inlined_call_operand.vmem [shape: f32[256,128], index: 2, kind: input, shape index: {}, may-alias: {2,4}]   ;;  %s1470_s3 = inlined_call_operand.vmem [shape: bf16[256,128], index: 3, kind: output, shape index: {0}]   ;;  %s1471_s4 = inlined_call_operand.vmem [shape: f32[256,128], index: 4, kind: output, shape index: {1}, may-alias: {2,4}]  }
   0x1   :  { %s1305_s17 = smov 0  }
   0x2 LB: > { %s27_s18 = sadd.s32 1, %s1270_s16  ;;  %p984_p0 = scmp.ge.s32.totalorder %s1274_s17, 1  ;;  %s1274_s17 = sphi %s1305_s17, %s15_s17   ;;  %s1270_s16 = sphi %s1303_s16, %s1473_s16   ;;  %s1266_s15 = sphi %s1301_s15, %s1472_s15  }
   0x3   : > { %p29_p1 = scmp.ge.s32.totalorder %s27_s18, 2  ;;  %p208_p2 = scmp.lt.s32.totalorder %s1274_s17, 3 }
   0x5   : > { %s1475_s18 = smov (%p29_p1, %s27_s18), 0  ;;  %p209_p3 = pnand %p984_p0, %p208_p2 }
   0x6   : > { %v1212_v0 = vld [vmem:[%s1468_s1 + $0x40] sm:$0xff] (!%p209_p3)   ;;  %s985_s21 = sshll.u32 (!%p209_p3), %s1266_s15, 4  ;;  %v1214_v2 = vld [vmem:[%s1468_s1 + $0x48] sm:$0xff] (!%p209_p3)   ;;  %v1216_v4 = vld [vmem:[%s1468_s1 + $0x50] sm:$0xff] (!%p209_p3)  }
   0x7   : > { %212 = sbr.rel (%p209_p3) target bundleno = 284 (0x11c), region = 32  ;;  %v1213_v1 = vld [vmem:[%s1468_s1] sm:$0xff] (!%p209_p3)   ;;  %1108 = vmatprep.subr.bf16.mxu0 (!%p209_p3), %v1212_v0  ;;  %1172 = vmatprep.subr.bf16.mxu1 (!%p209_p3), %v1212_v0  ;;  %v1215_v3 = vld [vmem:[%s1468_s1 + $0x8] sm:$0xff] (!%p209_p3)   ;;  %p256_p4 = scmp.lt.s32.totalorder (!%p209_p3), %s985_s21, 31  ;;  %v1217_v5 = vld [vmem:[%s1468_s1 + $0x10] sm:$0xff] (!%p209_p3)  }
   0x8   : > { %1109 = vmatpush3.bf16.msra.mxu0 (!%p209_p3), %v1213_v1  ;;  %1180 = vmatpush3.bf16.msra.mxu1 (!%p209_p3), %v1213_v1  ;;  %v1218_v6 = vld [vmem:[%s1468_s1 + $0x58] sm:$0xff] (!%p209_p3)   ;;  %v1220_v8 = vld [vmem:[%s1468_s1 + $0x60] sm:$0xff] (!%p209_p3)   ;;  %v1222_v10 = vld [vmem:[%s1468_s1 + $0x68] sm:$0xff] (!%p209_p3)  }
   0x9   : > { %1110 = vmatprep.subr.bf16.mxu0 (!%p209_p3), %v1214_v2  ;;  %1173 = vmatprep.subr.bf16.mxu1 (!%p209_p3), %v1214_v2  ;;  %v1219_v7 = vld [vmem:[%s1468_s1 + $0x18] sm:$0xff] (!%p209_p3)   ;;  %v1221_v9 = vld [vmem:[%s1468_s1 + $0x20] sm:$0xff] (!%p209_p3)   ;;  %v1223_v13 = vld [vmem:[%s1468_s1 + $0x28] sm:$0xff] (!%p209_p3)  }
   0xa   : > { %v1224_v14 = vld [vmem:[%s1468_s1 + $0x70] sm:$0xff] (!%p209_p3)   ;;  %v1226_v16 = vld [vmem:[%s1468_s1 + $0x78] sm:$0xff] (!%p209_p3)  }
   0xb   : > { %v1225_v15 = vld [vmem:[%s1468_s1 + $0x30] sm:$0xff] (!%p209_p3)   ;;  %v1227_v17 = vld [vmem:[%s1468_s1 + $0x38] sm:$0xff] (!%p209_p3)  }
   0xc   : > { %1111 = vmatpush3.bf16.msra.mxu0 (!%p209_p3), %v1215_v3  ;;  %1181 = vmatpush3.bf16.msra.mxu1 (!%p209_p3), %v1215_v3 }
   0xd   : > { %1112 = vmatprep.subr.bf16.mxu0 (!%p209_p3), %v1216_v4  ;;  %1174 = vmatprep.subr.bf16.mxu1 (!%p209_p3), %v1216_v4 }
   0xe   : > { %s1477_s21 = smov (!%p256_p4, %s985_s21), 31 }
   0xf   : > { %s1346_s10 = sshll.u32 %s1477_s21, 3  ;;  %s991_s12 = sshll.u32 %s1477_s21, 2 }
  0x10   : > { %1113 = vmatpush3.bf16.msra.mxu0 %v1217_v5  ;;  %1182 = vmatpush3.bf16.msra.mxu1 %v1217_v5  ;;  %s1355_s15 = scalar_lea.vmem %s1467_s0, %s1346_s10  ;;  %s276_s11 = scalar_lea.vmem %s1469_s2, %s1346_s10 }
  0x11   : > { %1114 = vmatprep.subr.bf16.mxu0 %v1218_v6  ;;  %1175 = vmatprep.subr.bf16.mxu1 %v1218_v6  ;;  %v1230_v11 = vld [vmem:[%s1355_s15 + $0x4] ss:$8 sps:$4 sm:$0xff]   ;;  %v1228_v18 = vld [vmem:[%s1355_s15] ss:$8 sps:$4 sm:$0xff]   ;;  %v1234_v20 = vld [vmem:[%s1355_s15 + $0x14] ss:$8 sps:$4 sm:$0xff]  }
  0x12   : > { %v1233_v12 = vld [vmem:[%s1355_s15 + $0x44] ss:$8 sps:$4 sm:$0xff]   ;;  %547 = vmatprep.mubr.bf16.mxu0 %v1230_v11  ;;  %v1231_v19 = vld [vmem:[%s1355_s15 + $0x40] ss:$8 sps:$4 sm:$0xff]   ;;  %v1236_v21 = vld [vmem:[%s1355_s15 + $0x54] ss:$8 sps:$4 sm:$0xff]  }
  0x13   : > { %579 = vmatprep.mubr.bf16.mxu1 %v1233_v12  ;;  %v1238_v22 = vld [vmem:[%s1355_s15 + $0x10] ss:$8 sps:$4 sm:$0xff]   ;;  %v1240_v24 = vld [vmem:[%s1355_s15 + $0x24] ss:$8 sps:$4 sm:$0xff]   ;;  %v1244_v26 = vld [vmem:[%s1355_s15 + $0x20] ss:$8 sps:$4 sm:$0xff]  }
  0x14   : > { %1115 = vmatpush3.bf16.msra.mxu0 %v1219_v7  ;;  %1183 = vmatpush3.bf16.msra.mxu1 %v1219_v7  ;;  %v1239_v23 = vld [vmem:[%s1355_s15 + $0x50] ss:$8 sps:$4 sm:$0xff]   ;;  %v1242_v25 = vld [vmem:[%s1355_s15 + $0x64] ss:$8 sps:$4 sm:$0xff]   ;;  %v1245_v27 = vld [vmem:[%s1355_s15 + $0x60] ss:$8 sps:$4 sm:$0xff]  }
  0x15   : > { %1116 = vmatprep.subr.bf16.mxu0 %v1220_v8  ;;  %1176 = vmatprep.subr.bf16.mxu1 %v1220_v8  ;;  %v1246_v28 = vld [vmem:[%s1355_s15 + $0x34] ss:$8 sps:$4 sm:$0xff]   ;;  %v1250_v30 = vld [vmem:[%s1355_s15 + $0x30] ss:$8 sps:$4 sm:$0xff]   ;;  %v783_v34 = vld [vmem:[%s276_s11] sm:$0xff] }
  0x16   : > { %v1248_v29 = vld [vmem:[%s1355_s15 + $0x74] ss:$8 sps:$4 sm:$0xff]   ;;  %v1251_v31 = vld [vmem:[%s1355_s15 + $0x70] ss:$8 sps:$4 sm:$0xff]   ;;  %v791_v35 = vld [vmem:[%s276_s11 + $0x40] sm:$0xff]  ;;  %s1413_s15 = scalar_lea.vmem %s1471_s4, %s1346_s10  ;;  %s1424_s10 = scalar_lea.vmem %s1470_s3, %s991_s12 }
  0x17   : > { %v784_v38 = vld [vmem:[%s276_s11 + $0x8] sm:$0xff]  ;;  %v785_v40 = vld [vmem:[%s276_s11 + $0x10] sm:$0xff]  ;;  %v786_v42 = vld [vmem:[%s276_s11 + $0x18] sm:$0xff] }
  0x18   : > { %1117 = vmatpush3.bf16.msra.mxu0 %v1221_v9  ;;  %1184 = vmatpush3.bf16.msra.mxu1 %v1221_v9  ;;  %v792_v39 = vld [vmem:[%s276_s11 + $0x48] sm:$0xff]  ;;  %v793_v41 = vld [vmem:[%s276_s11 + $0x50] sm:$0xff]  ;;  %v794_v43 = vld [vmem:[%s276_s11 + $0x58] sm:$0xff] }
  0x19   : > { %1118 = vmatprep.subr.bf16.mxu0 %v1222_v10  ;;  %1177 = vmatprep.subr.bf16.mxu1 %v1222_v10  ;;  %v1398_v44 = vld [vmem:[%s276_s11 + $0x20] sm:$0xff]  ;;  %v1403_v50 = vld [vmem:[%s276_s11 + $0x28] sm:$0xff]  ;;  %v1407_v52 = vld [vmem:[%s276_s11 + $0x30] sm:$0xff] }
  0x1a   : > { %v1400_v45 = vld [vmem:[%s276_s11 + $0x60] sm:$0xff]  ;;  %v1405_v51 = vld [vmem:[%s276_s11 + $0x68] sm:$0xff]  ;;  %v1415_v55 = vld [vmem:[%s276_s11 + $0x70] sm:$0xff] }
  0x1b   : > { %v1417_v56 = vld [vmem:[%s276_s11 + $0x38] sm:$0xff] }
  0x1c   : > { %1119 = vmatpush3.bf16.msra.mxu0 %v1223_v13  ;;  %1185 = vmatpush3.bf16.msra.mxu1 %v1223_v13  ;;  %v1419_v57 = vld [vmem:[%s276_s11 + $0x78] sm:$0xff] }
  0x1d   : > { %1120 = vmatprep.subr.bf16.mxu0 %v1224_v14  ;;  %1178 = vmatprep.subr.bf16.mxu1 %v1224_v14 }
  0x20   : > { %1121 = vmatpush3.bf16.msra.mxu0 %v1225_v15  ;;  %1186 = vmatpush3.bf16.msra.mxu1 %v1225_v15 }
  0x21   : > { %1122 = vmatprep.subr.bf16.mxu0 %v1226_v16  ;;  %1179 = vmatprep.subr.bf16.mxu1 %v1226_v16 }
  0x24   : > { %1123 = vmatpush3.bf16.msra.mxu0 %v1227_v17  ;;  %1187 = vmatpush3.bf16.msra.mxu1 %v1227_v17 }
  0x27   : > { %548 = vmatmul.mubr.bf16.vlgmr.msra.gmra.mrb[0].mxu0 %v1228_v18  ;;  %580 = vmatmul.mubr.bf16.vlgmr.msra.gmra.mrb[0].mxu1 %v1231_v19 }
  0x28   : > { %555 = vmatprep.mubr.bf16.mxu0 %v1234_v20  ;;  %587 = vmatprep.mubr.bf16.mxu1 %v1236_v21 }
  0x2f   : > { %556 = vmatmul.mubr.bf16.gmra.mrb[4].mxu0 %v1238_v22  ;;  %588 = vmatmul.mubr.bf16.gmra.mrb[4].mxu1 %v1239_v23 }
  0x30   : > { %563 = vmatprep.mubr.bf16.mxu0 %v1240_v24  ;;  %595 = vmatprep.mubr.bf16.mxu1 %v1242_v25 }
  0x37   : > { %564 = vmatmul.mubr.bf16.gmra.mrb[8].mxu0 %v1244_v26  ;;  %596 = vmatmul.mubr.bf16.gmra.mrb[8].mxu1 %v1245_v27 }
  0x38   : > { %571 = vmatprep.mubr.bf16.mxu0 %v1246_v28  ;;  %603 = vmatprep.mubr.bf16.mxu1 %v1248_v29 }
  0x3f   : > { %572 = vmatmul.mubr.bf16.gmra.mrb[12].mxu0 %v1250_v30  ;;  %604 = vmatmul.mubr.bf16.gmra.mrb[12].mxu1 %v1251_v31 }
  0xfa   : > { %v1124_v32 = vpop.f32.mrb[0].mxu0  ;;  %v1148_v33 = vpop.f32.mrb[0].mxu1 }
  0xfb   : > { %v1125_v36 = vpop.f32.mrb[1].mxu0  ;;  %v1149_v37 = vpop.f32.mrb[1].mxu1 }
  0xfc   : > { %v1126_v46 = vadd.f32 %v1125_v36, %v1124_v32  ;;  %v1150_v47 = vadd.f32 %v1149_v37, %v1148_v33  ;;  %v1127_v48 = vpop.f32.mrb[2].mxu0  ;;  %v1151_v49 = vpop.f32.mrb[2].mxu1 }
  0xfd   : > { %v1128_v53 = vpop.f32.mrb[3].mxu0  ;;  %v1152_v54 = vpop.f32.mrb[3].mxu1 }
  0xfe   : > { %v815_v58 = vadd.f32 %v1126_v46, %v783_v34  ;;  %v823_v59 = vadd.f32 %v1150_v47, %v791_v35  ;;  %v1129_v60 = vadd.f32 %v1128_v53, %v1127_v48  ;;  %v1153_v61 = vadd.f32 %v1152_v54, %v1151_v49 }
 0x100   : > { %v1064_v62 = vpack.c.bf16 %v1129_v60, %v1126_v46  ;;  %v816_v63 = vadd.f32 %v1129_v60, %v784_v38  ;;  %v1084_v0 = vpack.c.bf16 %v1153_v61, %v1150_v47  ;;  %v824_v1 = vadd.f32 %v1153_v61, %v792_v39  ;;  %831 = vst [vmem:[%s1413_s15] sm:$0xff] %v815_v58 }
 0x101   : > { %839 = vst [vmem:[%s1413_s15 + $0x40] sm:$0xff] %v823_v59 }
 0x102   : > { %1065 = vst [vmem:[%s1424_s10] sm:$0xff] %v1064_v62   ;;  %1104 = vst [vmem:[%s1424_s10 + $0x20] sm:$0xff] %v1084_v0   ;;  %v1130_v2 = vpop.f32.mrb[4].mxu0  ;;  %v1154_v3 = vpop.f32.mrb[4].mxu1 }
 0x103   : > { %832 = vst [vmem:[%s1413_s15 + $0x8] sm:$0xff] %v816_v63  ;;  %840 = vst [vmem:[%s1413_s15 + $0x48] sm:$0xff] %v824_v1  ;;  %v1131_v4 = vpop.f32.mrb[5].mxu0  ;;  %v1155_v5 = vpop.f32.mrb[5].mxu1 }
 0x104   : > { %v1132_v6 = vadd.f32 %v1131_v4, %v1130_v2  ;;  %v1156_v7 = vadd.f32 %v1155_v5, %v1154_v3  ;;  %v1133_v8 = vpop.f32.mrb[6].mxu0  ;;  %v1157_v9 = vpop.f32.mrb[6].mxu1 }
 0x105   : > { %v1134_v10 = vpop.f32.mrb[7].mxu0  ;;  %v1158_v11 = vpop.f32.mrb[7].mxu1 }
 0x106   : > { %v817_v12 = vadd.f32 %v1132_v6, %v785_v40  ;;  %v825_v13 = vadd.f32 %v1156_v7, %v793_v41  ;;  %v1135_v14 = vadd.f32 %v1134_v10, %v1133_v8  ;;  %v1159_v15 = vadd.f32 %v1158_v11, %v1157_v9 }
 0x108   : > { %v1069_v16 = vpack.c.bf16 %v1135_v14, %v1132_v6  ;;  %v818_v17 = vadd.f32 %v1135_v14, %v786_v42  ;;  %v1089_v18 = vpack.c.bf16 %v1159_v15, %v1156_v7  ;;  %v826_v19 = vadd.f32 %v1159_v15, %v794_v43  ;;  %833 = vst [vmem:[%s1413_s15 + $0x10] sm:$0xff] %v817_v12 }
 0x109   : > { %841 = vst [vmem:[%s1413_s15 + $0x50] sm:$0xff] %v825_v13 }
 0x10a   : > { %1101 = vst [vmem:[%s1424_s10 + $0x8] sm:$0xff] %v1069_v16   ;;  %1105 = vst [vmem:[%s1424_s10 + $0x28] sm:$0xff] %v1089_v18   ;;  %v1136_v20 = vpop.f32.mrb[8].mxu0  ;;  %v1160_v21 = vpop.f32.mrb[8].mxu1 }
 0x10b   : > { %834 = vst [vmem:[%s1413_s15 + $0x18] sm:$0xff] %v818_v17  ;;  %842 = vst [vmem:[%s1413_s15 + $0x58] sm:$0xff] %v826_v19  ;;  %v1137_v22 = vpop.f32.mrb[9].mxu0  ;;  %v1161_v23 = vpop.f32.mrb[9].mxu1 }
 0x10c   : > { %v1138_v24 = vadd.f32 %v1137_v22, %v1136_v20  ;;  %v1162_v25 = vadd.f32 %v1161_v23, %v1160_v21  ;;  %v1139_v26 = vpop.f32.mrb[10].mxu0  ;;  %v1163_v27 = vpop.f32.mrb[10].mxu1 }
 0x10d   : > { %v1140_v28 = vpop.f32.mrb[11].mxu0  ;;  %v1164_v29 = vpop.f32.mrb[11].mxu1 }
 0x10e   : > { %v819_v30 = vadd.f32 %v1138_v24, %v1398_v44  ;;  %v827_v31 = vadd.f32 %v1162_v25, %v1400_v45  ;;  %v1141_v32 = vadd.f32 %v1140_v28, %v1139_v26  ;;  %v1165_v33 = vadd.f32 %v1164_v29, %v1163_v27 }
 0x110   : > { %v1074_v34 = vpack.c.bf16 %v1141_v32, %v1138_v24  ;;  %v820_v35 = vadd.f32 %v1141_v32, %v1403_v50  ;;  %v1094_v36 = vpack.c.bf16 %v1165_v33, %v1162_v25  ;;  %v828_v37 = vadd.f32 %v1165_v33, %v1405_v51  ;;  %835 = vst [vmem:[%s1413_s15 + $0x20] sm:$0xff] %v819_v30 }
 0x111   : > { %843 = vst [vmem:[%s1413_s15 + $0x60] sm:$0xff] %v827_v31 }
 0x112   : > { %1102 = vst [vmem:[%s1424_s10 + $0x10] sm:$0xff] %v1074_v34   ;;  %1106 = vst [vmem:[%s1424_s10 + $0x30] sm:$0xff] %v1094_v36   ;;  %v1142_v38 = vpop.f32.mrb[12].mxu0  ;;  %v1166_v39 = vpop.f32.mrb[12].mxu1 }
 0x113   : > { %836 = vst [vmem:[%s1413_s15 + $0x28] sm:$0xff] %v820_v35  ;;  %844 = vst [vmem:[%s1413_s15 + $0x68] sm:$0xff] %v828_v37  ;;  %v1143_v40 = vpop.f32.mrb[13].mxu0  ;;  %v1167_v41 = vpop.f32.mrb[13].mxu1 }
 0x114   : > { %v1144_v42 = vadd.f32 %v1143_v40, %v1142_v38  ;;  %v1168_v43 = vadd.f32 %v1167_v41, %v1166_v39  ;;  %v1145_v44 = vpop.f32.mrb[14].mxu0  ;;  %v1169_v45 = vpop.f32.mrb[14].mxu1 }
 0x115   : > { %v1146_v46 = vpop.f32.mrb[15].mxu0  ;;  %v1170_v47 = vpop.f32.mrb[15].mxu1 }
 0x116   : > { %v821_v48 = vadd.f32 %v1144_v42, %v1407_v52  ;;  %v829_v49 = vadd.f32 %v1168_v43, %v1415_v55  ;;  %v1147_v50 = vadd.f32 %v1146_v46, %v1145_v44  ;;  %v1171_v51 = vadd.f32 %v1170_v47, %v1169_v45 }
 0x118   : > { %v1079_v53 = vpack.c.bf16 %v1147_v50, %v1144_v42  ;;  %v822_v54 = vadd.f32 %v1147_v50, %v1417_v56  ;;  %v1099_v58 = vpack.c.bf16 %v1171_v51, %v1168_v43  ;;  %v830_v59 = vadd.f32 %v1171_v51, %v1419_v57  ;;  %837 = vst [vmem:[%s1413_s15 + $0x30] sm:$0xff] %v821_v48 }
 0x119   : > { %845 = vst [vmem:[%s1413_s15 + $0x70] sm:$0xff] %v829_v49 }
 0x11a   : > { %1103 = vst [vmem:[%s1424_s10 + $0x18] sm:$0xff] %v1079_v53   ;;  %1107 = vst [vmem:[%s1424_s10 + $0x38] sm:$0xff] %v1099_v58  }
 0x11b   : > { %838 = vst [vmem:[%s1413_s15 + $0x38] sm:$0xff] %v822_v54  ;;  %846 = vst [vmem:[%s1413_s15 + $0x78] sm:$0xff] %v830_v59 }
 0x11c PF: > { %s15_s17 = sadd.s32 1, %s1274_s17   ;;  %s1472_s15 = smov %s1270_s16 }
 0x11d   : > { %p12_p5 = scmp.ge.s32.totalorder %s15_s17, 4   ;;  %s1473_s16 = smov %s1475_s18 }
 0x11f   :  { %14 = sbr.rel (!%p12_p5) target bundleno = 2 (0x2), region = 92 }

// kernel: lgcn_all_embeddings.5
= control target key start
LH: loop header
LB: loop body
LE: loop exit
PB: predicated region body
PF: predicated region fallthrough
CT: control target
= control target key end

     0   :  { %10 = vsyncpa [#allocation4], 0  ;;  %s1661_s0 = inlined_call_operand.vmem [shape: bf16[256,256], index: 0, kind: input, shape index: {}]   ;;  %s1662_s1 = inlined_call_operand.vmem [shape: bf16[256,128], index: 1, kind: input, shape index: {}]   ;;  %s1663_s2 = inlined_call_operand.vmem [shape: f32[256,128], index: 2, kind: input, shape index: {}, may-alias: {2,4}]   ;;  %s1664_s3 = inlined_call_operand.hbm [shape: bf16[256,128], index: 3, kind: output, shape index: {0}]   ;;  %s1665_s4 = inlined_call_operand.vmem [shape: f32[256,128], index: 4, kind: output, shape index: {1}, may-alias: {2,4}]  }
   0x1   :  { %12 = vsyncpa [#allocation4 + $0x1], 0  ;;  %s1413_s15 = smov 0   ;;  %s1415_s16 = smov 0  }
   0x2   :  { %s1417_s17 = smov 0   ;;  %s1419_s18 = smov 0  }
   0x3   :  { %s1421_s19 = smov 0   ;;  %s1423_s20 = smov 0  }
   0x4 LB: > { %s996_s21 = sadd.s32 4294967295, %s1383_s20   ;;  %s997_s22 = sadd.s32 4294967294, %s1383_s20   ;;  %s1383_s20 = sphi %s1423_s20, %s18_s20   ;;  %s1379_s19 = sphi %s1421_s19, %s1672_s19   ;;  %s1375_s18 = sphi %s1419_s18, %s1671_s18   ;;  %s1371_s17 = sphi %s1417_s17, %s1670_s17   ;;  %s1367_s16 = sphi %s1415_s16, %s1669_s16   ;;  %s1363_s15 = sphi %s1413_s15, %s1668_s15  }
   0x5   : > { %s30_s23 = sadd.s32 1, %s1379_s19  ;;  %s117_s24 = sadd.s32 1, %s1371_s17 }
   0x6   : > { %p32_p0 = scmp.ge.s32.totalorder %s30_s23, 2  ;;  %p127_p1 = scmp.ne.s32.totalorder %s1371_s17, %s1367_s16 }
   0x7   : > { %p128_p2 = scmp.eq.s32.totalorder %s996_s21, 1  ;;  %p133_p3 = scmp.ne.s32.totalorder %s1367_s16, %s1363_s15 }
   0x8   : > { %s1674_s23 = smov (%p32_p0, %s30_s23), 0  ;;  %p134_p5 = scmp.eq.s32.totalorder %s997_s22, 1 }
   0x9   : > { %p1453_p4 = por %p128_p2, %p127_p1  ;;  %s114_s26 = ssub.s32 %s1379_s19, %s1674_s23 }
   0xa   : > { %p1001_p6 = scmp.ge.s32.totalorder %s1383_s20, 1  ;;  %p115_p7 = scmp.eq.s32.totalorder %s114_s26, 0 }
   0xb   : > { %p1460_p8 = por %p134_p5, %p133_p3  ;;  %p211_p9 = scmp.lt.s32.totalorder %s1383_s20, 3 }
   0xc   : > { %s1466_s28 = scalar_select %p115_p7, %s1371_s17, %s117_s24  }
   0xd   : > { %p212_p10 = pnand %p1001_p6, %p211_p9 }
   0xe   : > { %v1265_v0 = vld [vmem:[%s1662_s1 + $0x40] sm:$0xff] (!%p212_p10)   ;;  %s1003_s5 = sshll.u32 (!%p212_p10), %s1375_s18, 4  ;;  %v1267_v2 = vld [vmem:[%s1662_s1 + $0x48] sm:$0xff] (!%p212_p10)   ;;  %v1269_v4 = vld [vmem:[%s1662_s1 + $0x50] sm:$0xff] (!%p212_p10)   ;;  %s247_s13 = sand.u32 (!%p212_p10), 1, %s1367_s16  }
   0xf   : > { %215 = sbr.rel (%p212_p10) target bundleno = 306 (0x132), region = 32  ;;  %v1266_v1 = vld [vmem:[%s1662_s1] sm:$0xff] (!%p212_p10)   ;;  %1128 = vmatprep.subr.bf16.mxu0 (!%p212_p10), %v1265_v0  ;;  %1192 = vmatprep.subr.bf16.mxu1 (!%p212_p10), %v1265_v0  ;;  %v1268_v3 = vld [vmem:[%s1662_s1 + $0x8] sm:$0xff] (!%p212_p10)   ;;  %p259_p11 = scmp.lt.s32.totalorder (!%p212_p10), %s1003_s5, 31  ;;  %v1270_v5 = vld [vmem:[%s1662_s1 + $0x10] sm:$0xff] (!%p212_p10)  }
  0x10   : > { %1129 = vmatpush3.bf16.msra.mxu0 (!%p212_p10), %v1266_v1  ;;  %1200 = vmatpush3.bf16.msra.mxu1 (!%p212_p10), %v1266_v1  ;;  %v1271_v6 = vld [vmem:[%s1662_s1 + $0x58] sm:$0xff] (!%p212_p10)   ;;  %v1273_v8 = vld [vmem:[%s1662_s1 + $0x60] sm:$0xff] (!%p212_p10)   ;;  %v1275_v10 = vld [vmem:[%s1662_s1 + $0x68] sm:$0xff] (!%p212_p10)   ;;  %s1080_s24 = sshll.u32 (!%p212_p10), %s1375_s18, 10  ;;  %s1615_s18 = scalar_lea.sflag (!%p212_p10), [#allocation4], %s247_s13 }
  0x11   : > { %1130 = vmatprep.subr.bf16.mxu0 (!%p212_p10), %v1267_v2  ;;  %1193 = vmatprep.subr.bf16.mxu1 (!%p212_p10), %v1267_v2  ;;  %v1272_v7 = vld [vmem:[%s1662_s1 + $0x18] sm:$0xff] (!%p212_p10)   ;;  %v1274_v9 = vld [vmem:[%s1662_s1 + $0x20] sm:$0xff] (!%p212_p10)   ;;  %v1276_v13 = vld [vmem:[%s1662_s1 + $0x28] sm:$0xff] (!%p212_p10)   ;;  %s1601_s7 = scalar_lea.hbm (!%p212_p10), %s1664_s3, %s1080_s24  ;;  %s1385_s9 = smov (!%p212_p10), [#allocation3]  }
  0x12   : > { %v1277_v14 = vld [vmem:[%s1662_s1 + $0x70] sm:$0xff] (!%p212_p10)   ;;  %v1279_v16 = vld [vmem:[%s1662_s1 + $0x78] sm:$0xff] (!%p212_p10)   ;;  %s1309_s11 = sshll.u32 (!%p212_p10), %s1385_s9, 4  ;;  %s1310_s11 = int_to_ptr.vmem [resolvable:$false] %s1309_s11 }
  0x13   : > { %v1278_v15 = vld [vmem:[%s1662_s1 + $0x30] sm:$0xff] (!%p212_p10)   ;;  %v1280_v17 = vld [vmem:[%s1662_s1 + $0x38] sm:$0xff] (!%p212_p10)   ;;  %s1311_s12 = scalar_lea.vmem (!%p212_p10), %s1310_s11, 2048 }
  0x14   : > { %1131 = vmatpush3.bf16.msra.mxu0 (!%p212_p10), %v1268_v3  ;;  %1201 = vmatpush3.bf16.msra.mxu1 (!%p212_p10), %v1268_v3 }
  0x15   : > { %1132 = vmatprep.subr.bf16.mxu0 (!%p212_p10), %v1269_v4  ;;  %1194 = vmatprep.subr.bf16.mxu1 (!%p212_p10), %v1269_v4 }
  0x16   : > { %s1676_s5 = smov (!%p259_p11, %s1003_s5), 31 }
  0x17   : > { %s1493_s30 = sshll.u32 %s1676_s5, 3 }
  0x18   : > { %1133 = vmatpush3.bf16.msra.mxu0 %v1270_v5  ;;  %1202 = vmatpush3.bf16.msra.mxu1 %v1270_v5  ;;  %s1502_s10 = scalar_lea.vmem %s1661_s0, %s1493_s30  ;;  %s279_s5 = scalar_lea.vmem %s1663_s2, %s1493_s30 }
  0x19   : > { %1134 = vmatprep.subr.bf16.mxu0 %v1271_v6  ;;  %1195 = vmatprep.subr.bf16.mxu1 %v1271_v6  ;;  %v1283_v11 = vld [vmem:[%s1502_s10 + $0x4] ss:$8 sps:$4 sm:$0xff]   ;;  %v1281_v18 = vld [vmem:[%s1502_s10] ss:$8 sps:$4 sm:$0xff]   ;;  %v1287_v20 = vld [vmem:[%s1502_s10 + $0x14] ss:$8 sps:$4 sm:$0xff]   ;;  %s1562_s22 = scalar_lea.vmem %s1665_s4, %s1493_s30 }
  0x1a   : > { %v1286_v12 = vld [vmem:[%s1502_s10 + $0x44] ss:$8 sps:$4 sm:$0xff]   ;;  %545 = vmatprep.mubr.bf16.mxu0 %v1283_v11  ;;  %v1284_v19 = vld [vmem:[%s1502_s10 + $0x40] ss:$8 sps:$4 sm:$0xff]   ;;  %v1289_v21 = vld [vmem:[%s1502_s10 + $0x54] ss:$8 sps:$4 sm:$0xff]  }
  0x1b   : > { %577 = vmatprep.mubr.bf16.mxu1 %v1286_v12  ;;  %v1291_v22 = vld [vmem:[%s1502_s10 + $0x10] ss:$8 sps:$4 sm:$0xff]   ;;  %v1293_v24 = vld [vmem:[%s1502_s10 + $0x24] ss:$8 sps:$4 sm:$0xff]   ;;  %v1297_v26 = vld [vmem:[%s1502_s10 + $0x20] ss:$8 sps:$4 sm:$0xff]  }
  0x1c   : > { %1135 = vmatpush3.bf16.msra.mxu0 %v1272_v7  ;;  %1203 = vmatpush3.bf16.msra.mxu1 %v1272_v7  ;;  %v1292_v23 = vld [vmem:[%s1502_s10 + $0x50] ss:$8 sps:$4 sm:$0xff]   ;;  %v1295_v25 = vld [vmem:[%s1502_s10 + $0x64] ss:$8 sps:$4 sm:$0xff]   ;;  %v1298_v27 = vld [vmem:[%s1502_s10 + $0x60] ss:$8 sps:$4 sm:$0xff]  }
  0x1d   : > { %1136 = vmatprep.subr.bf16.mxu0 %v1273_v8  ;;  %1196 = vmatprep.subr.bf16.mxu1 %v1273_v8  ;;  %v1299_v28 = vld [vmem:[%s1502_s10 + $0x34] ss:$8 sps:$4 sm:$0xff]   ;;  %v1303_v30 = vld [vmem:[%s1502_s10 + $0x30] ss:$8 sps:$4 sm:$0xff]   ;;  %v781_v34 = vld [vmem:[%s279_s5] sm:$0xff] }
  0x1e   : > { %v1301_v29 = vld [vmem:[%s1502_s10 + $0x74] ss:$8 sps:$4 sm:$0xff]   ;;  %v1304_v31 = vld [vmem:[%s1502_s10 + $0x70] ss:$8 sps:$4 sm:$0xff]   ;;  %v789_v35 = vld [vmem:[%s279_s5 + $0x40] sm:$0xff]  ;;  %s1002_s10 = sshll.u32 %s247_s13, 6 }
  0x1f   : > { %v782_v38 = vld [vmem:[%s279_s5 + $0x8] sm:$0xff]  ;;  %v783_v40 = vld [vmem:[%s279_s5 + $0x10] sm:$0xff]  ;;  %v784_v42 = vld [vmem:[%s279_s5 + $0x18] sm:$0xff]  ;;  %s1572_s30 = scalar_lea.vmem [#allocation3], %s1002_s10 }
  0x20   : > { %1137 = vmatpush3.bf16.msra.mxu0 %v1274_v9  ;;  %1204 = vmatpush3.bf16.msra.mxu1 %v1274_v9  ;;  %v790_v39 = vld [vmem:[%s279_s5 + $0x48] sm:$0xff]  ;;  %v791_v41 = vld [vmem:[%s279_s5 + $0x50] sm:$0xff]  ;;  %v792_v43 = vld [vmem:[%s279_s5 + $0x58] sm:$0xff]  ;;  %s864_s26 = sshll.u32 %s1572_s30, 4  ;;  %s1603_s26 = int_to_ptr.vmem [resolvable:$true] %s864_s26 }
  0x21   : > { %1138 = vmatprep.subr.bf16.mxu0 %v1275_v10  ;;  %1197 = vmatprep.subr.bf16.mxu1 %v1275_v10  ;;  %v1546_v44 = vld [vmem:[%s279_s5 + $0x20] sm:$0xff]  ;;  %v1552_v50 = vld [vmem:[%s279_s5 + $0x28] sm:$0xff]  ;;  %v1556_v52 = vld [vmem:[%s279_s5 + $0x30] sm:$0xff]  ;;  %s1305_s8 = scalar_lea.vmem %s1603_s26, 1024  ;;  %p1312_p1 = scmp.lt.s32.totalorder %s1603_s26, %s1310_s11 }
  0x22   : > { %v1548_v45 = vld [vmem:[%s279_s5 + $0x60] sm:$0xff]  ;;  %v1554_v51 = vld [vmem:[%s279_s5 + $0x68] sm:$0xff]  ;;  %v1564_v55 = vld [vmem:[%s279_s5 + $0x70] sm:$0xff]  ;;  %p1306_p12 = scmp.ne.s32.totalorder %s1603_s26, %s1305_s8  ;;  %p1313_p2 = scmp.lt.s32.totalorder %s1311_s12, %s1305_s8 }
  0x23   : > { %v1566_v56 = vld [vmem:[%s279_s5 + $0x38] sm:$0xff] }
  0x24   : > { %1139 = vmatpush3.bf16.msra.mxu0 %v1276_v13  ;;  %1205 = vmatpush3.bf16.msra.mxu1 %v1276_v13  ;;  %v1568_v57 = vld [vmem:[%s279_s5 + $0x78] sm:$0xff]  ;;  %p1307_p13 = pnand %p1306_p12, %p1453_p4  ;;  %p1314_p3 = por %p1313_p2, %p1312_p1 }
  0x25   : > { %1140 = vmatprep.subr.bf16.mxu0 %v1277_v14  ;;  %1198 = vmatprep.subr.bf16.mxu1 %v1277_v14 }
  0x26   : > { %p1308_p0 = pneg %p1307_p13 }
  0x28   : > { %1141 = vmatpush3.bf16.msra.mxu0 %v1278_v15  ;;  %1206 = vmatpush3.bf16.msra.mxu1 %v1278_v15  ;;  %p1315_p5 = pnand %p1314_p3, %p1308_p0 }
  0x29   : > { %1142 = vmatprep.subr.bf16.mxu0 %v1279_v16  ;;  %1199 = vmatprep.subr.bf16.mxu1 %v1279_v16 }
  0x2c   : > { %1143 = vmatpush3.bf16.msra.mxu0 %v1280_v17  ;;  %1207 = vmatpush3.bf16.msra.mxu1 %v1280_v17 }
  0x2f   : > { %546 = vmatmul.mubr.bf16.vlgmr.msra.gmra.mrb[0].mxu0 %v1281_v18  ;;  %578 = vmatmul.mubr.bf16.vlgmr.msra.gmra.mrb[0].mxu1 %v1284_v19 }
  0x30   : > { %553 = vmatprep.mubr.bf16.mxu0 %v1287_v20  ;;  %585 = vmatprep.mubr.bf16.mxu1 %v1289_v21 }
  0x37   : > { %554 = vmatmul.mubr.bf16.gmra.mrb[4].mxu0 %v1291_v22  ;;  %586 = vmatmul.mubr.bf16.gmra.mrb[4].mxu1 %v1292_v23 }
  0x38   : > { %561 = vmatprep.mubr.bf16.mxu0 %v1293_v24  ;;  %593 = vmatprep.mubr.bf16.mxu1 %v1295_v25 }
  0x3f   : > { %562 = vmatmul.mubr.bf16.gmra.mrb[8].mxu0 %v1297_v26  ;;  %594 = vmatmul.mubr.bf16.gmra.mrb[8].mxu1 %v1298_v27 }
  0x40   : > { %569 = vmatprep.mubr.bf16.mxu0 %v1299_v28  ;;  %601 = vmatprep.mubr.bf16.mxu1 %v1301_v29 }
  0x47   : > { %570 = vmatmul.mubr.bf16.gmra.mrb[12].mxu0 %v1303_v30  ;;  %602 = vmatmul.mubr.bf16.gmra.mrb[12].mxu1 %v1304_v31 }
 0x102   : > { %v1144_v32 = vpop.f32.mrb[0].mxu0  ;;  %v1168_v33 = vpop.f32.mrb[0].mxu1 }
 0x103   : > { %v1145_v36 = vpop.f32.mrb[1].mxu0  ;;  %v1169_v37 = vpop.f32.mrb[1].mxu1 }
 0x104   : > { %v1146_v46 = vadd.f32 %v1145_v36, %v1144_v32  ;;  %v1170_v47 = vadd.f32 %v1169_v37, %v1168_v33  ;;  %v1147_v48 = vpop.f32.mrb[2].mxu0  ;;  %v1171_v49 = vpop.f32.mrb[2].mxu1 }
 0x105   : > { %v1148_v53 = vpop.f32.mrb[3].mxu0  ;;  %v1172_v54 = vpop.f32.mrb[3].mxu1 }
 0x106   : > { %v813_v58 = vadd.f32 %v1146_v46, %v781_v34  ;;  %v821_v59 = vadd.f32 %v1170_v47, %v789_v35  ;;  %v1149_v60 = vadd.f32 %v1148_v53, %v1147_v48  ;;  %v1173_v61 = vadd.f32 %v1172_v54, %v1171_v49 }
 0x108   : > { %v1084_v62 = vpack.c.bf16 %v1149_v60, %v1146_v46  ;;  %v814_v63 = vadd.f32 %v1149_v60, %v782_v38  ;;  %v1104_v0 = vpack.c.bf16 %v1173_v61, %v1170_v47  ;;  %v822_v1 = vadd.f32 %v1173_v61, %v790_v39  ;;  %829 = vst [vmem:[%s1562_s22] sm:$0xff] %v813_v58 }
 0x109   : > { %837 = vst [vmem:[%s1562_s22 + $0x40] sm:$0xff] %v821_v59 }
 0x10a   : > { %1085 = vst [vmem:[%s1572_s30] sm:$0xff] %v1084_v62   ;;  %1124 = vst [vmem:[%s1572_s30 + $0x20] sm:$0xff] %v1104_v0   ;;  %v1150_v2 = vpop.f32.mrb[4].mxu0  ;;  %v1174_v3 = vpop.f32.mrb[4].mxu1 }
 0x10b   : > { %830 = vst [vmem:[%s1562_s22 + $0x8] sm:$0xff] %v814_v63  ;;  %838 = vst [vmem:[%s1562_s22 + $0x48] sm:$0xff] %v822_v1  ;;  %v1151_v4 = vpop.f32.mrb[5].mxu0  ;;  %v1175_v5 = vpop.f32.mrb[5].mxu1 }
 0x10c   : > { %v1152_v6 = vadd.f32 %v1151_v4, %v1150_v2  ;;  %v1176_v7 = vadd.f32 %v1175_v5, %v1174_v3  ;;  %v1153_v8 = vpop.f32.mrb[6].mxu0  ;;  %v1177_v9 = vpop.f32.mrb[6].mxu1 }
 0x10d   : > { %v1154_v10 = vpop.f32.mrb[7].mxu0  ;;  %v1178_v11 = vpop.f32.mrb[7].mxu1 }
 0x10e   : > { %v815_v12 = vadd.f32 %v1152_v6, %v783_v40  ;;  %v823_v13 = vadd.f32 %v1176_v7, %v791_v41  ;;  %v1155_v14 = vadd.f32 %v1154_v10, %v1153_v8  ;;  %v1179_v15 = vadd.f32 %v1178_v11, %v1177_v9 }
 0x110   : > { %v1089_v16 = vpack.c.bf16 %v1155_v14, %v1152_v6  ;;  %v816_v17 = vadd.f32 %v1155_v14, %v784_v42  ;;  %v1109_v18 = vpack.c.bf16 %v1179_v15, %v1176_v7  ;;  %v824_v19 = vadd.f32 %v1179_v15, %v792_v43  ;;  %831 = vst [vmem:[%s1562_s22 + $0x10] sm:$0xff] %v815_v12 }
 0x111   : > { %839 = vst [vmem:[%s1562_s22 + $0x50] sm:$0xff] %v823_v13 }
 0x112   : > { %1121 = vst [vmem:[%s1572_s30 + $0x8] sm:$0xff] %v1089_v16   ;;  %1125 = vst [vmem:[%s1572_s30 + $0x28] sm:$0xff] %v1109_v18   ;;  %v1156_v20 = vpop.f32.mrb[8].mxu0  ;;  %v1180_v21 = vpop.f32.mrb[8].mxu1 }
 0x113   : > { %832 = vst [vmem:[%s1562_s22 + $0x18] sm:$0xff] %v816_v17  ;;  %840 = vst [vmem:[%s1562_s22 + $0x58] sm:$0xff] %v824_v19  ;;  %v1157_v22 = vpop.f32.mrb[9].mxu0  ;;  %v1181_v23 = vpop.f32.mrb[9].mxu1 }
 0x114   : > { %v1158_v24 = vadd.f32 %v1157_v22, %v1156_v20  ;;  %v1182_v25 = vadd.f32 %v1181_v23, %v1180_v21  ;;  %v1159_v26 = vpop.f32.mrb[10].mxu0  ;;  %v1183_v27 = vpop.f32.mrb[10].mxu1 }
 0x115   : > { %v1160_v28 = vpop.f32.mrb[11].mxu0  ;;  %v1184_v29 = vpop.f32.mrb[11].mxu1 }
 0x116   : > { %v817_v30 = vadd.f32 %v1158_v24, %v1546_v44  ;;  %v825_v31 = vadd.f32 %v1182_v25, %v1548_v45  ;;  %v1161_v32 = vadd.f32 %v1160_v28, %v1159_v26  ;;  %v1185_v33 = vadd.f32 %v1184_v29, %v1183_v27 }
 0x118   : > { %v1094_v34 = vpack.c.bf16 %v1161_v32, %v1158_v24  ;;  %v818_v35 = vadd.f32 %v1161_v32, %v1552_v50  ;;  %v1114_v36 = vpack.c.bf16 %v1185_v33, %v1182_v25  ;;  %v826_v37 = vadd.f32 %v1185_v33, %v1554_v51  ;;  %833 = vst [vmem:[%s1562_s22 + $0x20] sm:$0xff] %v817_v30 }
 0x119   : > { %841 = vst [vmem:[%s1562_s22 + $0x60] sm:$0xff] %v825_v31 }
 0x11a   : > { %1122 = vst [vmem:[%s1572_s30 + $0x10] sm:$0xff] %v1094_v34   ;;  %1126 = vst [vmem:[%s1572_s30 + $0x30] sm:$0xff] %v1114_v36   ;;  %v1162_v38 = vpop.f32.mrb[12].mxu0  ;;  %v1186_v39 = vpop.f32.mrb[12].mxu1 }
 0x11b   : > { %834 = vst [vmem:[%s1562_s22 + $0x28] sm:$0xff] %v818_v35  ;;  %842 = vst [vmem:[%s1562_s22 + $0x68] sm:$0xff] %v826_v37  ;;  %v1163_v40 = vpop.f32.mrb[13].mxu0  ;;  %v1187_v41 = vpop.f32.mrb[13].mxu1 }
 0x11c   : > { %v1164_v42 = vadd.f32 %v1163_v40, %v1162_v38  ;;  %v1188_v43 = vadd.f32 %v1187_v41, %v1186_v39  ;;  %v1165_v44 = vpop.f32.mrb[14].mxu0  ;;  %v1189_v45 = vpop.f32.mrb[14].mxu1 }
 0x11d   : > { %v1166_v46 = vpop.f32.mrb[15].mxu0  ;;  %v1190_v47 = vpop.f32.mrb[15].mxu1 }
 0x11e   : > { %v819_v48 = vadd.f32 %v1164_v42, %v1556_v52  ;;  %v827_v49 = vadd.f32 %v1188_v43, %v1564_v55  ;;  %v1167_v50 = vadd.f32 %v1166_v46, %v1165_v44  ;;  %v1191_v51 = vadd.f32 %v1190_v47, %v1189_v45 }
 0x120   : > { %v1099_v53 = vpack.c.bf16 %v1167_v50, %v1164_v42  ;;  %v820_v54 = vadd.f32 %v1167_v50, %v1566_v56  ;;  %v1119_v58 = vpack.c.bf16 %v1191_v51, %v1188_v43  ;;  %v828_v52 = vadd.f32 %v1191_v51, %v1568_v57  ;;  %835 = vst [vmem:[%s1562_s22 + $0x30] sm:$0xff] %v819_v48 }
 0x121   : > { %843 = vst [vmem:[%s1562_s22 + $0x70] sm:$0xff] %v827_v49 }
 0x122   : > { %1123 = vst [vmem:[%s1572_s30 + $0x18] sm:$0xff] %v1099_v53   ;;  %1127 = vst [vmem:[%s1572_s30 + $0x38] sm:$0xff] %v1119_v58  }
 0x123   : > { %836 = vst [vmem:[%s1562_s22 + $0x38] sm:$0xff] %v820_v54  ;;  %844 = vst [vmem:[%s1562_s22 + $0x78] sm:$0xff] %v828_v52 }
 0x124   : > { %1318 = shalt.err (!%p1315_p5)
}
 0x125   : > { %s1319_s5 = scalar_lea.hbm %s1601_s7, 1024  ;;  %s1323_s14 = scalar_lea.hbm %s1664_s3, 2048 }
 0x126   : > { %p1320_p6 = scmp.ne.s32.totalorder %s1601_s7, %s1319_s5  ;;  %p1324_p10 = scmp.lt.u32.totalorder %s1601_s7, %s1664_s3 }
 0x127   : > { %p1325_p11 = scmp.lt.u32.totalorder %s1323_s14, %s1319_s5  ;;  %p1327_p13 = scmp.lt.u32.totalorder %s1319_s5, %s1601_s7 }
 0x128   : > { %p1321_p7 = pnand %p1320_p6, %p1453_p4 }
 0x129   : > { %p1326_p12 = por %p1325_p11, %p1324_p10 }
 0x12a   : > { %p1322_p9 = pneg %p1321_p7 }
 0x12b   : > { %p1328_p0 = por %p1327_p13, %p1326_p12 }
 0x12d   : > { %p1329_p1 = pnand %p1328_p0, %p1322_p9 }
 0x12f   : > { %1332 = shalt.err (!%p1329_p1)
}
 0x130   : > { %s1386_s30 = smov 64   ;;  %s1387_s24 = smov 4  }
 0x131   : > { %1208 = dma.vmem_to_hbm [thread:$0]  (%p1453_p4), %s1603_s26, 1024, %s1601_s7, %s1615_s18, %s1386_s30, %s1386_s30, %s1387_s24  }
 0x132 PF: > { %p1214_p2 = scmp.ge.s32.totalorder %s1383_s20, 2  ;;  %s883_s29 = sand.u32 1, %s1363_s15  }
 0x133   : > { %s884_s6 = scalar_lea.sflag [#allocation4], %s883_s29 }
 0x134   : > { %p1211_p3 = pnand %p1214_p2, %p1460_p8 }
 0x136   : > { %1358 = dma.done.wait (!%p1211_p3), %s884_s6, 1024  }
 0x137   : > { %1360 = vsyncadd (!%p1211_p3), %s884_s6, 4294966272  ;;  %s18_s20 = sadd.s32 1, %s1383_s20   ;;  %s1668_s15 = smov %s1367_s16 }
 0x138   : > { %p15_p5 = scmp.ge.s32.totalorder %s18_s20, 4   ;;  %s1669_s16 = smov %s1371_s17 }
 0x139   : > { %s1670_s17 = smov %s1466_s28  ;;  %s1671_s18 = smov %s1379_s19 }
 0x13a   : > { %s1672_s19 = smov %s1674_s23  ;;  %17 = sbr.rel (!%p15_p5) target bundleno = 4 (0x4), region = 97 }
 0x141   :  { %897 = vsyncpa [#allocation4], 1 }
 0x142   :  { %899 = vsyncpa [#allocation4 + $0x1], 1 }

</bundles_post_ra>
